<compile_context>
chip_gen: v7x
topology: tpu7x:2x2x1
jax: 0.10.0
libtpu: 0.0.40
codegen_flags: <defaults>
</compile_context>

<pallas_src>
import jax
import jax.numpy as jnp
from jax.experimental import pallas as pl
from jax.experimental.pallas import tpu as pltpu

HIDDEN = 768      # distilbert hidden size (769 = 768 + 1 extra feature)
D1 = 384
D2 = 96
D2P = 128         # lane-dense padding of D2
BN_EPS = 1e-4
LEAKY_SLOPE = 1e-6


def _head_kernel(cls_ref, fts_ref, w1a_ref, wb1_ref, w2_ref, bw2_ref, out_ref):
    # ReLU on the BERT CLS token (ReLU(h)[:,0,:] == ReLU(h[:,0,:])).
    # Dropout(0.3) is the identity in eval mode.
    # ReLU is done in f32 (avoids bf16 VPU max on v5e), then cast to bf16 so
    # the first matmul rides the native bf16 MXU path against the bf16 w1a.
    x = jnp.maximum(cls_ref[...], 0.0).astype(jnp.bfloat16)              # (B,768) bf16

    # ln1 (+ folded BatchNorm) over concat([cls, fts], 1): split 769 = 768+1.
    # w1a is bf16, pre-scaled by gamma*rsqrt(var+eps); accumulate in f32.
    y = jnp.dot(x, w1a_ref[...], preferred_element_type=jnp.float32)     # (B,384) f32
    w1b = wb1_ref[0:1, :]                                                 # (1,384) extra-feature column
    b1 = wb1_ref[1:2, :]                                                  # (1,384) folded BN bias
    y = y + fts_ref[...] * w1b + b1

    # ln2 (padded to 128 lanes) + leaky_relu(negative_slope=1e-6).
    # w2 is stored bf16 (DMA bytes); upcast to f32 in VMEM so the f32
    # activations keep full precision and accumulation stays f32.
    b2 = bw2_ref[0:1, :]
    w3 = bw2_ref[1:2, :]
    z = jnp.dot(y, w2_ref[...].astype(jnp.float32),
                preferred_element_type=jnp.float32) + b2                  # (B,128)
    z = jnp.where(z >= 0.0, z, LEAKY_SLOPE * z)
    # Pad lanes 96..127 of w2 are zero and b2[96]==1 -> z[:,96]==1, so the
    # reduction below picks up w3_pad[96]==b3 exactly once (the `top` bias).

    # top: lane reduction on the XLU instead of a 1-column MXU matmul.
    out = jnp.sum(z * w3, axis=-1, keepdims=True)                         # (B,1)

    # Lane-dense store: broadcast the scalar across all 128 output lanes
    # (a (B,1) output would force masked vst.msk partial stores).
    out_ref[...] = jnp.broadcast_to(out, out_ref.shape).astype(out_ref.dtype)


def bmodel_head(cls_tok, fts, kp):
    """cls_tok: (B, 768) f32, fts: (B, 1) f32 -> (B, 1) f32."""
    B = cls_tok.shape[0]
    operands = [cls_tok, fts, kp["w1a"], kp["wb1"], kp["w2"], kp["bw2"]]
    vmem = pl.BlockSpec(memory_space=pltpu.MemorySpace.VMEM)
    # No grid: at small B the call is weight-DMA / launch-overhead bound, so
    # the whole working set (<1 MiB) lives in VMEM and one invocation does it.
    # For large B, switch to grid=(pl.cdiv(B, TB),) with TB>=256 (multiple of
    # 16 for bf16 sublane packing), batch-tiled cls/fts/out BlockSpecs,
    # constant-index weight specs with pipeline_mode=pl.Buffered(1), and
    # dimension_semantics=("parallel",) so v7x shards across both TensorCores.
    out = pl.pallas_call(
        _head_kernel,
        out_shape=jax.ShapeDtypeStruct((B, D2P), jnp.float32),
        in_specs=[vmem] * len(operands),
        out_specs=vmem,
    )(*operands)
    return out[:, :1]


def init_params(key):
    """Parameters in the original PyTorch layout."""
    ks = jax.random.split(key, 10)
    w1 = jax.random.normal(ks[0], (D1, HIDDEN + 1), jnp.float32) * 0.02   # ln1.weight
    b1 = jax.random.normal(ks[1], (1, D1), jnp.float32) * 0.02            # ln1.bias
    w2 = jax.random.normal(ks[2], (D2, D1), jnp.float32) * 0.02           # ln2.weight
    b2 = jax.random.normal(ks[3], (1, D2), jnp.float32) * 0.02            # ln2.bias
    w3 = jax.random.normal(ks[4], (1, D2), jnp.float32) * 0.02            # top.weight
    b3 = jax.random.normal(ks[5], (1, 1), jnp.float32) * 0.02             # top.bias
    gamma = 1.0 + 0.1 * jax.random.normal(ks[6], (1, D1), jnp.float32)    # bn.weight
    beta = 0.05 * jax.random.normal(ks[7], (1, D1), jnp.float32)          # bn.bias
    mean = jax.random.normal(ks[8], (1, D1), jnp.float32) * 0.1           # running_mean
    var = jnp.abs(jax.random.normal(ks[9], (1, D1), jnp.float32)) * 0.5 + 0.5
    return dict(w1=w1, b1=b1, w2=w2, b2=b2, w3=w3, b3=b3,
                gamma=gamma, beta=beta, mean=mean, var=var)


def fold_params(p):
    """Wrapper-side algebra (one-time): fold BN into ln1, pad ln2/top to 128
    lanes, fold the `top` bias into the padded lane, pre-transpose, bf16 the
    two weight matrices, pack the small (1,N) vectors into two operands."""
    scale = p["gamma"] * jax.lax.rsqrt(p["var"] + BN_EPS)                 # (1, 384)
    w1a = (jnp.transpose(p["w1"][:, :HIDDEN]) * scale).astype(jnp.bfloat16)  # (768,384) bf16
    w1b = p["w1"][:, HIDDEN:].reshape(1, D1) * scale                      # (1, 384)
    b1 = (p["b1"] - p["mean"]) * scale + p["beta"]                        # (1, 384)
    wb1 = jnp.concatenate([w1b, b1], axis=0)                              # (2, 384) f32

    w2p = (jnp.zeros((D1, D2P), jnp.float32)
           .at[:, :D2].set(jnp.transpose(p["w2"]))
           .astype(jnp.bfloat16))                                          # (384,128) bf16
    b2p = jnp.zeros((1, D2P), jnp.float32).at[:, :D2].set(p["b2"]).at[0, D2].set(1.0)
    w3p = (jnp.zeros((1, D2P), jnp.float32)
           .at[:, :D2].set(p["w3"])
           .at[0, D2].set(p["b3"][0, 0]))                                  # b3 folded in
    bw2 = jnp.concatenate([b2p, w3p], axis=0)                              # (2, 128) f32
    return dict(w1a=w1a, wb1=wb1, w2=w2p, bw2=bw2)


def reference_head(cls_tok, fts, p):
    """Pure-f32 reference following the original (unfolded) module math."""
    x = jnp.maximum(cls_tok, 0.0)
    cat = jnp.concatenate([x, fts], axis=1)                               # (B, 769)
    y = cat @ jnp.transpose(p["w1"]) + p["b1"]
    y = (y - p["mean"]) * jax.lax.rsqrt(p["var"] + BN_EPS) * p["gamma"] + p["beta"]
    z = y @ jnp.transpose(p["w2"]) + p["b2"]
    z = jnp.where(z >= 0.0, z, LEAKY_SLOPE * z)
    return z @ jnp.transpose(p["w3"]) + p["b3"]


if __name__ == "__main__":
    key = jax.random.PRNGKey(0)
    k_ids, k_fts, k_emb, k_par = jax.random.split(key, 4)

    B, S, VOCAB = 2, 8, 100
    ids = jax.random.randint(k_ids, (B, S), 0, VOCAB)
    masks = jnp.ones((B, S), jnp.float32)
    fts = jax.random.normal(k_fts, (B, 1), jnp.float32)

    # TODO(synk): distill_bert (pretrained HF transformer) has no in-script
    # equivalent; replaced by a deterministic embedding lookup producing the
    # (B, S, 768) hidden states consumed by the linear head.
    emb_table = jax.random.normal(k_emb, (VOCAB, HIDDEN), jnp.float32) * 0.5
    hidden = emb_table[ids] * masks[..., None]          # (B, S, 768)
    cls_tok = hidden[:, 0, :]                            # (B, 768)

    params = init_params(k_par)
    kparams = fold_params(params)

    out = bmodel_head(cls_tok, fts, kparams)
    jax.block_until_ready(out)

    ref = reference_head(cls_tok, fts, params)
    assert out.shape == (B, 1)
    # bf16 is used for the CLS activations and both weight matrices (w1a, w2);
    # accumulation stays f32.  Loosened tolerance reflects that precision
    # choice, not a bug.
    assert jnp.allclose(out, ref, atol=2e-2, rtol=2e-2), (out, ref)
    print("KERNEL_OK")
</pallas_src>

<mosaic_0001>
module attributes {stable_mosaic.version = 11 : i64} {
  func.func @_head_kernel(%arg0: memref<2x768xf32, #tpu.memory_space<vmem>>, %arg1: memref<2x1xf32, #tpu.memory_space<vmem>>, %arg2: memref<768x384xbf16, #tpu.memory_space<vmem>>, %arg3: memref<2x384xf32, #tpu.memory_space<vmem>>, %arg4: memref<384x128xbf16, #tpu.memory_space<vmem>>, %arg5: memref<2x128xf32, #tpu.memory_space<vmem>>, %arg6: memref<2x128xf32, #tpu.memory_space<vmem>>) attributes {dimension_semantics = [], scalar_prefetch = 0 : i64, scratch_operands = 0 : i64, tpu.core_type = #tpu.core_type<tc>} {
    %c0 = arith.constant 0 : index
    %c0_0 = arith.constant 0 : index
    %0 = vector.load %arg0[%c0, %c0_0] : memref<2x768xf32, #tpu.memory_space<vmem>>, vector<2x768xf32>
    %cst = arith.constant 0.000000e+00 : f32
    %1 = vector.broadcast %cst : f32 to vector<2x768xf32>
    %2 = arith.maximumf %0, %1 : vector<2x768xf32>
    %3 = arith.truncf %2 : vector<2x768xf32> to vector<2x768xbf16>
    %c0_1 = arith.constant 0 : index
    %c0_2 = arith.constant 0 : index
    %4 = vector.load %arg2[%c0_1, %c0_2] : memref<768x384xbf16, #tpu.memory_space<vmem>>, vector<768x384xbf16>
    %cst_3 = arith.constant dense<0.000000e+00> : vector<2x384xf32>
    %5 = tpu.matmul %3, %4, %cst_3 {dimension_numbers = #tpu.dot_dimension_numbers<[1], [0], [0], [1], [0, 0, 1, 1], [], []>} : vector<2x768xbf16>, vector<768x384xbf16>, vector<2x384xf32> -> vector<2x384xf32>
    %c0_4 = arith.constant 0 : index
    %c0_5 = arith.constant 0 : index
    %6 = vector.load %arg3[%c0_4, %c0_5] : memref<2x384xf32, #tpu.memory_space<vmem>>, vector<1x384xf32>
    %c1 = arith.constant 1 : index
    %c0_6 = arith.constant 0 : index
    %7 = vector.load %arg3[%c1, %c0_6] : memref<2x384xf32, #tpu.memory_space<vmem>>, vector<1x384xf32>
    %c0_7 = arith.constant 0 : index
    %c0_8 = arith.constant 0 : index
    %8 = vector.load %arg1[%c0_7, %c0_8] : memref<2x1xf32, #tpu.memory_space<vmem>>, vector<2x1xf32>
    %9 = vector.broadcast %8 : vector<2x1xf32> to vector<2x384xf32>
    %10 = vector.broadcast %6 : vector<1x384xf32> to vector<2x384xf32>
    %11 = arith.mulf %9, %10 : vector<2x384xf32>
    %12 = arith.addf %5, %11 : vector<2x384xf32>
    %13 = vector.broadcast %7 : vector<1x384xf32> to vector<2x384xf32>
    %14 = arith.addf %12, %13 : vector<2x384xf32>
    %c0_9 = arith.constant 0 : index
    %c0_10 = arith.constant 0 : index
    %15 = vector.load %arg5[%c0_9, %c0_10] : memref<2x128xf32, #tpu.memory_space<vmem>>, vector<1x128xf32>
    %c1_11 = arith.constant 1 : index
    %c0_12 = arith.constant 0 : index
    %16 = vector.load %arg5[%c1_11, %c0_12] : memref<2x128xf32, #tpu.memory_space<vmem>>, vector<1x128xf32>
    %c0_13 = arith.constant 0 : index
    %c0_14 = arith.constant 0 : index
    %17 = vector.load %arg4[%c0_13, %c0_14] : memref<384x128xbf16, #tpu.memory_space<vmem>>, vector<384x128xbf16>
    %18 = arith.extf %17 : vector<384x128xbf16> to vector<384x128xf32>
    %cst_15 = arith.constant dense<0.000000e+00> : vector<2x128xf32>
    %19 = tpu.matmul %14, %18, %cst_15 {dimension_numbers = #tpu.dot_dimension_numbers<[1], [0], [0], [1], [0, 0, 1, 1], [], []>} : vector<2x384xf32>, vector<384x128xf32>, vector<2x128xf32> -> vector<2x128xf32>
    %20 = vector.broadcast %15 : vector<1x128xf32> to vector<2x128xf32>
    %21 = arith.addf %19, %20 : vector<2x128xf32>
    %cst_16 = arith.constant 0.000000e+00 : f32
    %22 = vector.broadcast %cst_16 : f32 to vector<2x128xf32>
    %23 = arith.cmpf oge, %21, %22 : vector<2x128xf32>
    %cst_17 = arith.constant 9.99999997E-7 : f32
    %24 = vector.broadcast %cst_17 : f32 to vector<2x128xf32>
    %25 = arith.mulf %24, %21 : vector<2x128xf32>
    %26 = arith.select %23, %21, %25 : vector<2x128xi1>, vector<2x128xf32>
    %27 = vector.broadcast %16 : vector<1x128xf32> to vector<2x128xf32>
    %28 = arith.mulf %26, %27 : vector<2x128xf32>
    %cst_18 = arith.constant dense<0.000000e+00> : vector<2xf32>
    %29 = vector.multi_reduction <add>, %28, %cst_18 [1] : vector<2x128xf32> to vector<2xf32>
    %30 = vector.shape_cast %29 : vector<2xf32> to vector<2x1xf32>
    %31 = vector.shape_cast %30 : vector<2x1xf32> to vector<2x1xf32>
    %32 = vector.broadcast %31 : vector<2x1xf32> to vector<2x128xf32>
    %c0_19 = arith.constant 0 : index
    %c0_20 = arith.constant 0 : index
    %33 = vector.load %arg6[%c0_19, %c0_20] : memref<2x128xf32, #tpu.memory_space<vmem>>, vector<2x128xf32>
    tpu.vector_store %arg6[%c0_19, %c0_20], %32 {strides = array<i32>} : memref<2x128xf32, #tpu.memory_space<vmem>>, vector<2x128xf32>,
    return
  }
}

</mosaic_0001>

<bundles_post_ra>
// kernel: tpu_custom_call.1
= control target key start
LH: loop header
LB: loop body
LE: loop exit
PB: predicated region body
PF: predicated region fallthrough
CT: control target
= control target key end

     0   :  { %11 = vsyncpa [#allocation3], 0  ;;  %s2537_s0 = inlined_call_operand.hbm [shape: f32[2,768], index: 0, kind: input, shape index: {}]   ;;  %s2538_s1 = inlined_call_operand.vmem [shape: f32[2,1], index: 1, kind: input, shape index: {}]   ;;  %s2539_s2 = inlined_call_operand.hbm [shape: bf16[768,384], index: 2, kind: input, shape index: {}]   ;;  %s2540_s3 = inlined_call_operand.vmem [shape: f32[2,384], index: 3, kind: input, shape index: {}]   ;;  %s2541_s4 = inlined_call_operand.hbm [shape: bf16[384,128], index: 4, kind: input, shape index: {}]   ;;  %s2542_s5 = inlined_call_operand.vmem [shape: f32[2,128], index: 5, kind: input, shape index: {}]   ;;  %s2543_s6 = inlined_call_operand.hbm [shape: f32[2,128], index: 6, kind: output, shape index: {}]  }
   0x1   :  { %12 = vsyncpa [#allocation6], 0 }
   0x2   :  { %13 = vsyncpa [#allocation4], 0  ;;  %s2403_s21 = smov [#allocation5]   ;;  %s2309_s25 = scalar_lea.hbm %s2539_s2, 18432 }
   0x3   :  { %s31_s22 = sshll.u32 %s2403_s21, 4  ;;  %p2310_p0 = scmp.ne.s32.totalorder %s2539_s2, %s2309_s25  ;;  %s32_s22 = int_to_ptr.vmem [resolvable:$true] %s31_s22 }
   0x4   :  { %p2313_p1 = scmp.lt.u32.totalorder %s2309_s25, %s2539_s2 }
   0x6   :  { %p2315_p2 = pnand %p2313_p1, %p2310_p0 }
   0x8   :  { %2318 = shalt.err (!%p2315_p2)
}
   0x9   :  { %s2319_s30 = scalar_lea.vmem %s32_s22, 18432  ;;  %p2324_p4 = scmp.lt.s32.totalorder %s32_s22, %s32_s22 }
   0xa   :  { %p2320_p3 = scmp.ne.s32.totalorder %s32_s22, %s2319_s30  ;;  %p2325_p5 = scmp.lt.s32.totalorder %s2319_s30, %s2319_s30 }
   0xc   :  { %p2326_p6 = por %p2325_p5, %p2324_p4 }
   0xe   :  { %p2327_p7 = pnand %p2326_p6, %p2320_p3 }
  0x10   :  { %2330 = shalt.err (!%p2327_p7)
}
  0x11   :  { %s2404_s7 = smov 192   ;;  %s2405_s8 = smov 12  }
  0x12   :  { %37 = dma.hbm_to_vmem [thread:$0]  %s2539_s2, 18432, %s32_s22, [#allocation6], %s2404_s7, %s2404_s7, %s2405_s8  }
  0x13   :  { %s2406_s11 = smov [#allocation2]   ;;  %s2407_s13 = smov [#allocation7]  }
  0x14   :  { %s20_s12 = sshll.u32 %s2406_s11, 4  ;;  %s45_s14 = sshll.u32 %s2407_s13, 4  ;;  %s21_s12 = int_to_ptr.vmem [resolvable:$true] %s20_s12  ;;  %s46_s14 = int_to_ptr.vmem [resolvable:$true] %s45_s14 }
  0x15   :  { %s2331_s17 = scalar_lea.hbm %s2537_s0, 192 }
  0x16   :  { %p2332_p8 = scmp.ne.s32.totalorder %s2537_s0, %s2331_s17  ;;  %p2335_p9 = scmp.lt.u32.totalorder %s2331_s17, %s2537_s0 }
  0x18   :  { %p2337_p10 = pnand %p2335_p9, %p2332_p8 }
  0x1a   :  { %2340 = shalt.err (!%p2337_p10)
}
  0x1b   :  { %s2341_s2 = scalar_lea.vmem %s21_s12, 192  ;;  %p2346_p12 = scmp.lt.s32.totalorder %s21_s12, %s21_s12 }
  0x1c   :  { %p2342_p11 = scmp.ne.s32.totalorder %s21_s12, %s2341_s2  ;;  %p2347_p13 = scmp.lt.s32.totalorder %s2341_s2, %s2341_s2 }
  0x1e   :  { %p2348_p0 = por %p2347_p13, %p2346_p12 }
  0x20   :  { %p2349_p1 = pnand %p2348_p0, %p2342_p11 }
  0x22   :  { %2352 = shalt.err (!%p2349_p1)
}
  0x23   :  { %23 = dma.hbm_to_vmem [thread:$0]  %s2537_s0, 192, %s21_s12, [#allocation3]  }
  0x24   :  { %s2353_s26 = scalar_lea.hbm %s2541_s4, 3072 }
  0x25   :  { %p2354_p2 = scmp.ne.s32.totalorder %s2541_s4, %s2353_s26  ;;  %p2357_p3 = scmp.lt.u32.totalorder %s2353_s26, %s2541_s4 }
  0x27   :  { %p2359_p4 = pnand %p2357_p3, %p2354_p2 }
  0x29   :  { %2362 = shalt.err (!%p2359_p4)
}
  0x2a   :  { %s2363_s7 = scalar_lea.vmem %s46_s14, 3072  ;;  %p2368_p6 = scmp.lt.s32.totalorder %s46_s14, %s46_s14 }
  0x2b   :  { %p2364_p5 = scmp.ne.s32.totalorder %s46_s14, %s2363_s7  ;;  %p2369_p7 = scmp.lt.s32.totalorder %s2363_s7, %s2363_s7 }
  0x2d   :  { %p2370_p8 = por %p2369_p7, %p2368_p6 }
  0x2f   :  { %p2371_p9 = pnand %p2370_p8, %p2364_p5 }
  0x31   :  { %2374 = shalt.err (!%p2371_p9)
}
  0x32   :  { %s2408_s0 = smov 64   ;;  %s2409_s8 = smov 4  }
  0x33   :  { %51 = dma.hbm_to_vmem [thread:$0]  %s2541_s4, 3072, %s46_s14, [#allocation6], %s2408_s0, %s2408_s0, %s2409_s8  }
  0x34   :  { %2397 = dma.done.wait [#allocation3], 192  }
  0x35   :  { %2398 = vsyncadd [#allocation3], 4294967104 }
  0x36   :  { %2399 = dma.done.wait [#allocation6], 21504  }
  0x37   :  { %2400 = vsyncadd [#allocation6], 4294945792  ;;  %v2117_v0 = vld [vmem:[#allocation5 + $0x4] ss:$12 sps:$4 sm:$0xff]   ;;  %v2121_v2 = vld [vmem:[#allocation5] ss:$12 sps:$4 sm:$0xff]   ;;  %v74_v41 = vlaneseq }
  0x38   :  { %v2119_v1 = vld [vmem:[#allocation5 + $0x184] ss:$12 sps:$4 sm:$0xff]   ;;  %1095 = vmatprep.subr.bf16.mxu0 %v2117_v0  ;;  %v2122_v3 = vld [vmem:[#allocation5 + $0x180] ss:$12 sps:$4 sm:$0xff]   ;;  %v2123_v4 = vld [vmem:[#allocation5 + $0x1c] ss:$12 sps:$4 sm:$0xff]  }
  0x39   :  { %1136 = vmatprep.subr.bf16.mxu1 %v2119_v1  ;;  %1096 = vmatpush1.bf16.msra.mxu0 %v2121_v2  ;;  %v2125_v5 = vld [vmem:[#allocation5 + $0x19c] ss:$12 sps:$4 sm:$0xff]   ;;  %v2127_v6 = vld [vmem:[#allocation5 + $0x18] ss:$12 sps:$4 sm:$0xff]   ;;  %v2129_v8 = vld [vmem:[#allocation5 + $0x34] ss:$12 sps:$4 sm:$0xff]  }
  0x3a   :  { %1137 = vmatpush1.bf16.msra.mxu1 %v2122_v3  ;;  %1097 = vmatprep.subr.bf16.mxu0 %v2123_v4  ;;  %v2128_v7 = vld [vmem:[#allocation5 + $0x198] ss:$12 sps:$4 sm:$0xff]   ;;  %v2131_v9 = vld [vmem:[#allocation5 + $0x1b4] ss:$12 sps:$4 sm:$0xff]   ;;  %v2133_v10 = vld [vmem:[#allocation5 + $0x30] ss:$12 sps:$4 sm:$0xff]  }
  0x3b   :  { %1138 = vmatprep.subr.bf16.mxu1 %v2125_v5  ;;  %v2134_v11 = vld [vmem:[#allocation5 + $0x1b0] ss:$12 sps:$4 sm:$0xff]   ;;  %v2135_v12 = vld [vmem:[#allocation5 + $0x4c] ss:$12 sps:$4 sm:$0xff]   ;;  %v2139_v14 = vld [vmem:[#allocation5 + $0x48] ss:$12 sps:$4 sm:$0xff]  }
  0x3c   :  { %v2137_v13 = vld [vmem:[#allocation5 + $0x1cc] ss:$12 sps:$4 sm:$0xff]   ;;  %v2140_v15 = vld [vmem:[#allocation5 + $0x1c8] ss:$12 sps:$4 sm:$0xff]   ;;  %v2141_v16 = vld [vmem:[#allocation5 + $0x64] ss:$12 sps:$4 sm:$0xff]  }
  0x3d   :  { %1098 = vmatpush1.bf16.msra.mxu0 %v2127_v6  ;;  %v2143_v17 = vld [vmem:[#allocation5 + $0x1e4] ss:$12 sps:$4 sm:$0xff]   ;;  %v2145_v18 = vld [vmem:[#allocation5 + $0x60] ss:$12 sps:$4 sm:$0xff]   ;;  %v2147_v20 = vld [vmem:[#allocation5 + $0x7c] ss:$12 sps:$4 sm:$0xff]  }
  0x3e   :  { %1139 = vmatpush1.bf16.msra.mxu1 %v2128_v7  ;;  %1099 = vmatprep.subr.bf16.mxu0 %v2129_v8  ;;  %v2146_v19 = vld [vmem:[#allocation5 + $0x1e0] ss:$12 sps:$4 sm:$0xff]   ;;  %v2149_v21 = vld [vmem:[#allocation5 + $0x1fc] ss:$12 sps:$4 sm:$0xff]   ;;  %v2151_v22 = vld [vmem:[#allocation5 + $0x78] ss:$12 sps:$4 sm:$0xff]  }
  0x3f   :  { %1140 = vmatprep.subr.bf16.mxu1 %v2131_v9  ;;  %v2152_v23 = vld [vmem:[#allocation5 + $0x1f8] ss:$12 sps:$4 sm:$0xff]   ;;  %v2153_v24 = vld [vmem:[#allocation5 + $0x94] ss:$12 sps:$4 sm:$0xff]   ;;  %v2410_v26 = vmov 0   ;;  %v2487_v47 = vshrl.u32 %v74_v41, 7 }
  0x40   :  { %v2155_v25 = vld [vmem:[#allocation5 + $0x214] ss:$12 sps:$4 sm:$0xff]   ;;  %2116 = vset.pattern.permute.xlu0 %v2410_v26  ;;  %v2157_v27 = vld [vmem:[#allocation5 + $0x90] ss:$12 sps:$4 sm:$0xff]   ;;  %v2159_v29 = vld [vmem:[#allocation5 + $0xac] ss:$12 sps:$4 sm:$0xff]  }
  0x41   :  { %1100 = vmatpush1.bf16.msra.mxu0 %v2133_v10  ;;  %v2158_v28 = vld [vmem:[#allocation5 + $0x210] ss:$12 sps:$4 sm:$0xff]   ;;  %v2161_v30 = vld [vmem:[#allocation5 + $0x22c] ss:$12 sps:$4 sm:$0xff]   ;;  %v2163_v31 = vld [vmem:[#allocation5 + $0xa8] ss:$12 sps:$4 sm:$0xff]  }
  0x42   :  { %1141 = vmatpush1.bf16.msra.mxu1 %v2134_v11  ;;  %1101 = vmatprep.subr.bf16.mxu0 %v2135_v12  ;;  %v2164_v32 = vld [vmem:[#allocation5 + $0x228] ss:$12 sps:$4 sm:$0xff]   ;;  %v2165_v33 = vld [vmem:[#allocation5 + $0xc4] ss:$12 sps:$4 sm:$0xff]   ;;  %v2169_v35 = vld [vmem:[#allocation5 + $0xc0] ss:$12 sps:$4 sm:$0xff]  }
  0x43   :  { %1142 = vmatprep.subr.bf16.mxu1 %v2137_v13  ;;  %v2167_v34 = vld [vmem:[#allocation5 + $0x244] ss:$12 sps:$4 sm:$0xff]   ;;  %v2170_v36 = vld [vmem:[#allocation5 + $0x240] ss:$12 sps:$4 sm:$0xff]   ;;  %v2171_v37 = vld [vmem:[#allocation5 + $0xdc] ss:$12 sps:$4 sm:$0xff]  }
  0x44   :  { %v2173_v38 = vld [vmem:[#allocation5 + $0x25c] ss:$12 sps:$4 sm:$0xff]   ;;  %v2411_v39 = vmov 1983009808   ;;  %v2175_v42 = vld [vmem:[#allocation5 + $0xd8] ss:$12 sps:$4 sm:$0xff]  }
  0x45   :  { %1102 = vmatpush1.bf16.msra.mxu0 %v2139_v14  ;;  %v72_v40 = vunpack.c.l.s4 %v2411_v39  ;;  %v2176_v43 = vld [vmem:[#allocation5 + $0x258] ss:$12 sps:$4 sm:$0xff]   ;;  %v2177_v44 = vld [vmem:[#allocation5 + $0xf4] ss:$12 sps:$4 sm:$0xff]   ;;  %v2181_v48 = vld [vmem:[#allocation5 + $0xf0] ss:$12 sps:$4 sm:$0xff]  }
  0x46   :  { %1143 = vmatpush1.bf16.msra.mxu1 %v2140_v15  ;;  %1103 = vmatprep.subr.bf16.mxu0 %v2141_v16  ;;  %v2179_v45 = vld [vmem:[#allocation5 + $0x274] ss:$12 sps:$4 sm:$0xff]   ;;  %v2182_v49 = vld [vmem:[#allocation5 + $0x270] ss:$12 sps:$4 sm:$0xff]   ;;  %v2183_v50 = vld [vmem:[#allocation5 + $0x10c] ss:$12 sps:$4 sm:$0xff]  }
  0x47   :  { %1144 = vmatprep.subr.bf16.mxu1 %v2143_v17  ;;  %v73_v46 = vunpack.c.0.s8 %v72_v40  ;;  %v2185_v51 = vld [vmem:[#allocation5 + $0x28c] ss:$12 sps:$4 sm:$0xff]   ;;  %v2187_v53 = vld [vmem:[#allocation5 + $0x108] ss:$12 sps:$4 sm:$0xff]   ;;  %v2189_v57 = vld [vmem:[#allocation5 + $0x124] ss:$12 sps:$4 sm:$0xff]  }
  0x48   :  { %v64_v54 = vld [vmem:[#allocation2] sm:$0xff]  ;;  %v2191_v58 = vld [vmem:[#allocation5 + $0x2a4] ss:$12 sps:$4 sm:$0xff]   ;;  %v2193_v61 = vld [vmem:[#allocation5 + $0x120] ss:$12 sps:$4 sm:$0xff]   ;;  %vm2413_vm0 = vmmov 0  }
  0x49   :  { %1104 = vmatpush1.bf16.msra.mxu0 %v2145_v18  ;;  %v2490_v52 = vsub.s32 %v73_v46, %v2487_v47  ;;  %v2188_v55 = vld [vmem:[#allocation5 + $0x288] ss:$12 sps:$4 sm:$0xff]   ;;  %v66_v56 = vmax.f32 %v64_v54, 0.0  ;;  %v2194_v62 = vld [vmem:[#allocation5 + $0x2a0] ss:$12 sps:$4 sm:$0xff]   ;;  %vm1607_vm2 = vcmask 1041408  }
  0x4a   :  { %1145 = vmatpush1.bf16.msra.mxu1 %v2146_v19  ;;  %1105 = vmatprep.subr.bf16.mxu0 %v2147_v20  ;;  %v2195_v1 = vld [vmem:[#allocation5 + $0x13c] ss:$12 sps:$4 sm:$0xff]   ;;  %v2199_v5 = vld [vmem:[#allocation5 + $0x138] ss:$12 sps:$4 sm:$0xff]   ;;  %v2201_v8 = vld [vmem:[#allocation5 + $0x154] ss:$12 sps:$4 sm:$0xff]  }
  0x4b   :  { %1146 = vmatprep.subr.bf16.mxu1 %v2149_v21  ;;  %v77_v59 = vrot.slane %v66_v56, %v2490_v52  ;;  %v70_v60 = vcombine.high %v66_v56, %v66_v56  ;;  %v2197_v2 = vld [vmem:[#allocation5 + $0x2bc] ss:$12 sps:$4 sm:$0xff]   ;;  %v2200_v6 = vld [vmem:[#allocation5 + $0x2b8] ss:$12 sps:$4 sm:$0xff]   ;;  %v2203_v9 = vld [vmem:[#allocation5 + $0x2d4] ss:$12 sps:$4 sm:$0xff]  }
  0x4c   :  { %v2205_v10 = vld [vmem:[#allocation5 + $0x150] ss:$12 sps:$4 sm:$0xff]   ;;  %v2207_v12 = vld [vmem:[#allocation5 + $0x16c] ss:$12 sps:$4 sm:$0xff]   ;;  %v2211_v14 = vld [vmem:[#allocation5 + $0x168] ss:$12 sps:$4 sm:$0xff]  }
  0x4d   :  { %1106 = vmatpush1.bf16.msra.mxu0 %v2151_v22  ;;  %v85_v63 = vcombine.high %v77_v59, %v77_v59  ;;  %v84_v0 = vrot.slane %v70_v60, %v2490_v52  ;;  %v2206_v11 = vld [vmem:[#allocation5 + $0x2d0] ss:$12 sps:$4 sm:$0xff]   ;;  %v2209_v13 = vld [vmem:[#allocation5 + $0x2ec] ss:$12 sps:$4 sm:$0xff]   ;;  %v2212_v15 = vld [vmem:[#allocation5 + $0x2e8] ss:$12 sps:$4 sm:$0xff]   ;;  %v2497_v19 = vpack.c.bf16 %v77_v59, %v77_v59 }
  0x4e   :  { %1147 = vmatpush1.bf16.msra.mxu1 %v2152_v23  ;;  %1107 = vmatprep.subr.bf16.mxu0 %v2153_v24  ;;  %v2215_v16 = vld [vmem:[#allocation5 + $0x304] ss:$12 sps:$4 sm:$0xff]   ;;  %v2216_v17 = vld [vmem:[#allocation5 + $0xc8] ss:$12 sps:$4 sm:$0xff]   ;;  %v2213_v18 = vld [vmem:[#allocation5 + $0x300] ss:$12 sps:$4 sm:$0xff]  }
  0x4f   :  { %1148 = vmatprep.subr.bf16.mxu1 %v2155_v25  ;;  %v102_v3 = vpack.c.bf16 %v85_v63, %v85_v63  ;;  %v86_v4 = vcombine.high %v84_v0, %v84_v0  ;;  %v2499_v20 = vpack.c.bf16 %v84_v0, %v84_v0  ;;  %v2217_v21 = vld [vmem:[#allocation5 + $0x8] ss:$12 sps:$4 sm:$0xff]   ;;  %v2221_v23 = vld [vmem:[#allocation5 + $0xe0] ss:$12 sps:$4 sm:$0xff]   ;;  %v2218_v24 = vld [vmem:[#allocation5 + $0x318] ss:$12 sps:$4 sm:$0xff]  }
  0x50   :  { %v2220_v22 = vld [vmem:[#allocation5 + $0x31c] ss:$12 sps:$4 sm:$0xff]   ;;  %v2222_v25 = vld [vmem:[#allocation5 + $0x20] ss:$12 sps:$4 sm:$0xff]   ;;  %v2238_v40 = vld [vmem:[#allocation5 + $0x378] ss:$12 sps:$4 sm:$0xff]  }
  0x51   :  { %1108 = vmatpush1.bf16.msra.mxu0 %v2157_v27  ;;  %1127 = vmatprep.mubr.bf16.mxu0 %v102_v3  ;;  %v2494_v7 = vpack.c.bf16 %v86_v4, %v86_v4  ;;  %v2225_v26 = vld [vmem:[#allocation5 + $0x334] ss:$12 sps:$4 sm:$0xff]   ;;  %v2226_v27 = vld [vmem:[#allocation5 + $0xf8] ss:$12 sps:$4 sm:$0xff]   ;;  %v2260_v56 = vld [vmem:[#allocation5 + $0x3dc] ss:$12 sps:$4 sm:$0xff]  }
  0x52   :  { %1149 = vmatpush1.bf16.msra.mxu1 %v2158_v28  ;;  %1109 = vmatprep.subr.bf16.mxu0 %v2159_v29  ;;  %v2223_v28 = vld [vmem:[#allocation5 + $0x330] ss:$12 sps:$4 sm:$0xff]   ;;  %v2227_v29 = vld [vmem:[#allocation5 + $0x38] ss:$12 sps:$4 sm:$0xff]   ;;  %v2241_v39 = vld [vmem:[#allocation5 + $0x140] ss:$12 sps:$4 sm:$0xff]  }
  0x53   :  { %1150 = vmatprep.subr.bf16.mxu1 %v2161_v30  ;;  %1168 = vmatprep.mubr.bf16.mxu1 %v2494_v7  ;;  %v2230_v30 = vld [vmem:[#allocation5 + $0x34c] ss:$12 sps:$4 sm:$0xff]   ;;  %v2265_v63 = vld [vmem:[#allocation5 + $0x3f4] ss:$12 sps:$4 sm:$0xff]   ;;  %s2415_s18 = smov [#allocation8]  }
  0x54   :  { %v2242_v41 = vld [vmem:[#allocation5 + $0x80] ss:$12 sps:$4 sm:$0xff]   ;;  %v2258_v60 = vld [vmem:[#allocation5 + $0x3d8] ss:$12 sps:$4 sm:$0xff]   ;;  %s1618_s19 = sshll.u32 %s2415_s18, 4  ;;  %s1619_s19 = int_to_ptr.vmem [resolvable:$true] %s1618_s19 }
  0x55   :  { %1110 = vmatpush1.bf16.msra.mxu0 %v2163_v31  ;;  %v2231_v31 = vld [vmem:[#allocation5 + $0x110] ss:$12 sps:$4 sm:$0xff]   ;;  %v2250_v46 = vld [vmem:[#allocation5 + $0x3ac] ss:$12 sps:$4 sm:$0xff]   ;;  %s2375_s20 = scalar_lea.vmem %s1619_s19, 32  ;;  %p2380_p11 = scmp.lt.s32.totalorder %s1619_s19, %s1619_s19 }
  0x56   :  { %1151 = vmatpush1.bf16.msra.mxu1 %v2164_v32  ;;  %1111 = vmatprep.subr.bf16.mxu0 %v2165_v33  ;;  %v2228_v32 = vld [vmem:[#allocation5 + $0x348] ss:$12 sps:$4 sm:$0xff]   ;;  %v2232_v33 = vld [vmem:[#allocation5 + $0x50] ss:$12 sps:$4 sm:$0xff]   ;;  %v2253_v54 = vld [vmem:[#allocation5 + $0x3c0] ss:$12 sps:$4 sm:$0xff]   ;;  %p2376_p10 = scmp.ne.s32.totalorder %s1619_s19, %s2375_s20  ;;  %p2381_p12 = scmp.lt.s32.totalorder %s2375_s20, %s2375_s20 }
  0x57   :  { %1152 = vmatprep.subr.bf16.mxu1 %v2167_v34  ;;  %v2235_v34 = vld [vmem:[#allocation5 + $0x364] ss:$12 sps:$4 sm:$0xff]  }
  0x58   :  { %v2266_v0 = vld [vmem:[#allocation5 + $0x278] ss:$12 sps:$4 sm:$0xff]   ;;  %p2382_p13 = por %p2381_p12, %p2380_p11 }
  0x59   :  { %1112 = vmatpush1.bf16.msra.mxu0 %v2169_v35  ;;  %v2236_v35 = vld [vmem:[#allocation5 + $0x128] ss:$12 sps:$4 sm:$0xff]  }
  0x5a   :  { %1153 = vmatpush1.bf16.msra.mxu1 %v2170_v36  ;;  %1113 = vmatprep.subr.bf16.mxu0 %v2171_v37  ;;  %v2233_v36 = vld [vmem:[#allocation5 + $0x360] ss:$12 sps:$4 sm:$0xff]   ;;  %v2237_v37 = vld [vmem:[#allocation5 + $0x68] ss:$12 sps:$4 sm:$0xff]   ;;  %p2383_p0 = pnand %p2382_p13, %p2376_p10 }
  0x5b   :  { %1154 = vmatprep.subr.bf16.mxu1 %v2173_v38  ;;  %v2240_v38 = vld [vmem:[#allocation5 + $0x37c] ss:$12 sps:$4 sm:$0xff]  }
  0x5d   :  { %1114 = vmatpush1.bf16.msra.mxu0 %v2175_v42  ;;  %v2245_v42 = vld [vmem:[#allocation5 + $0x394] ss:$12 sps:$4 sm:$0xff]  }
  0x5e   :  { %1155 = vmatpush1.bf16.msra.mxu1 %v2176_v43  ;;  %1115 = vmatprep.subr.bf16.mxu0 %v2177_v44  ;;  %v2246_v43 = vld [vmem:[#allocation5 + $0x158] ss:$12 sps:$4 sm:$0xff]   ;;  %v2243_v44 = vld [vmem:[#allocation5 + $0x390] ss:$12 sps:$4 sm:$0xff]  }
  0x5f   :  { %1156 = vmatprep.subr.bf16.mxu1 %v2179_v45  ;;  %v2247_v45 = vld [vmem:[#allocation5 + $0x98] ss:$12 sps:$4 sm:$0xff]  }
  0x61   :  { %1116 = vmatpush1.bf16.msra.mxu0 %v2181_v48  ;;  %v2251_v48 = vld [vmem:[#allocation5 + $0x170] ss:$12 sps:$4 sm:$0xff]  }
  0x62   :  { %1157 = vmatpush1.bf16.msra.mxu1 %v2182_v49  ;;  %1117 = vmatprep.subr.bf16.mxu0 %v2183_v50  ;;  %v2248_v49 = vld [vmem:[#allocation5 + $0x3a8] ss:$12 sps:$4 sm:$0xff]   ;;  %v2252_v50 = vld [vmem:[#allocation5 + $0xb0] ss:$12 sps:$4 sm:$0xff]  }
  0x63   :  { %1158 = vmatprep.subr.bf16.mxu1 %v2185_v51  ;;  %v2255_v51 = vld [vmem:[#allocation5 + $0x3c4] ss:$12 sps:$4 sm:$0xff]  }
  0x65   :  { %1118 = vmatpush1.bf16.msra.mxu0 %v2187_v53  ;;  %v2256_v53 = vld [vmem:[#allocation5 + $0x248] ss:$12 sps:$4 sm:$0xff]  }
  0x66   :  { %1159 = vmatpush1.bf16.msra.mxu1 %v2188_v55  ;;  %1119 = vmatprep.subr.bf16.mxu0 %v2189_v57  ;;  %v2257_v55 = vld [vmem:[#allocation5 + $0x188] ss:$12 sps:$4 sm:$0xff]   ;;  %v65_v57 = vld [vmem:[#allocation2 + $0x8] sm:$0xf] }
  0x67   :  { %1160 = vmatprep.subr.bf16.mxu1 %v2191_v58  ;;  %v2261_v58 = vld [vmem:[#allocation5 + $0x260] ss:$12 sps:$4 sm:$0xff]   ;;  %v67_v59 = vmax.f32 %v65_v57, 0.0  ;;  %v1876_v57 = vld [vmem:[#allocation7 + $0x30] sm:$0xff]  }
  0x69   :  { %1120 = vmatpush1.bf16.msra.mxu0 %v2193_v61  ;;  %v2262_v61 = vld [vmem:[#allocation5 + $0x1a0] ss:$12 sps:$4 sm:$0xff]  }
  0x6a   :  { %1161 = vmatpush1.bf16.msra.mxu1 %v2194_v62  ;;  %1121 = vmatprep.subr.bf16.mxu0 %v2195_v1  ;;  %v93_v62 = vrot.slane %v67_v59, %v2490_v52  ;;  %v2272_v52 = vld [vmem:[#allocation5 + $0x1d0] ss:$12 sps:$4 sm:$0xff]  }
  0x6b   :  { %1162 = vmatprep.subr.bf16.mxu1 %v2197_v2  ;;  %v2263_v2 = vld [vmem:[#allocation5 + $0x3f0] ss:$12 sps:$4 sm:$0xff]  }
  0x6c   :  { %v94_v1 = vcombine.high %v93_v62, %v93_v62  ;;  %v1877_v59 = vld [vmem:[#allocation7 + $0x38] sm:$0xff]  }
  0x6d   :  { %1122 = vmatpush1.bf16.msra.mxu0 %v2199_v5  ;;  %v2270_v5 = vld [vmem:[#allocation5 + $0x40c] ss:$12 sps:$4 sm:$0xff]  }
  0x6e   :  { %1163 = vmatpush1.bf16.msra.mxu1 %v2200_v6  ;;  %1123 = vmatprep.subr.bf16.mxu0 %v2201_v8  ;;  %v106_v4 = vpack.c.bf16 %v94_v1, %v94_v1  ;;  %v2271_v6 = vld [vmem:[#allocation5 + $0x290] ss:$12 sps:$4 sm:$0xff]   ;;  %v2268_v8 = vld [vmem:[#allocation5 + $0x408] ss:$12 sps:$4 sm:$0xff]   ;;  %v1890_v1 = vld [vmem:[#allocation7 + $0xa0] sm:$0xff]  }
  0x6f   :  { %1164 = vmatprep.subr.bf16.mxu1 %v2203_v9  ;;  %v302_v9 = vld [vmem:[%s2538_s1] sm:$0x3] }
  0x70   :  { %305 = vperm.xlu0 %2116, %v302_v9  }
  0x71   :  { %1124 = vmatpush1.bf16.msra.mxu0 %v2205_v10  ;;  %v2275_v10 = vld [vmem:[#allocation5 + $0x424] ss:$12 sps:$4 sm:$0xff]  }
  0x72   :  { %1165 = vmatpush1.bf16.msra.mxu1 %v2206_v11  ;;  %1125 = vmatprep.subr.bf16.mxu0 %v2207_v12  ;;  %v2273_v11 = vld [vmem:[#allocation5 + $0x420] ss:$12 sps:$4 sm:$0xff]   ;;  %v2277_v12 = vld [vmem:[#allocation5 + $0x1e8] ss:$12 sps:$4 sm:$0xff]  }
  0x73   :  { %1166 = vmatprep.subr.bf16.mxu1 %v2209_v13  ;;  %v2280_v13 = vld [vmem:[#allocation5 + $0x43c] ss:$12 sps:$4 sm:$0xff]  }
  0x75   :  { %1126 = vmatpush1.bf16.msra.mxu0 %v2211_v14  ;;  %v2281_v14 = vld [vmem:[#allocation5 + $0x2c0] ss:$12 sps:$4 sm:$0xff]  }
  0x76   :  { %1167 = vmatpush1.bf16.msra.mxu1 %v2212_v15  ;;  %1177 = vmatprep.subr.bf16.mxu0 %v2215_v16  ;;  %v2278_v15 = vld [vmem:[#allocation5 + $0x438] ss:$12 sps:$4 sm:$0xff]   ;;  %v2282_v16 = vld [vmem:[#allocation5 + $0x200] ss:$12 sps:$4 sm:$0xff]  }
  0x77   :  { %1894 = vmatprep.subr.bf16.mxu1 %v2216_v17  ;;  %v2285_v17 = vld [vmem:[#allocation5 + $0x454] ss:$12 sps:$4 sm:$0xff]  }
  0x78   :  { %1128 = vmatmul.mubr.bf16.vlgmr.msra.gmra.mrb[0].mxu0 %v2497_v19 }
  0x79   :  { %1169 = vmatmul.mubr.bf16.vlgmr.msra.gmra.mrb[0].mxu1 %v2499_v20  ;;  %1178 = vmatpush1.bf16.msra.mxu0 %v2213_v18  ;;  %v2286_v18 = vld [vmem:[#allocation5 + $0x2d8] ss:$12 sps:$4 sm:$0xff]  }
  0x7a   :  { %1895 = vmatpush3.bf16.msra.mxu1 %v2217_v21  ;;  %1179 = vmatprep.subr.bf16.mxu0 %v2220_v22  ;;  %v2287_v21 = vld [vmem:[#allocation5 + $0x218] ss:$12 sps:$4 sm:$0xff]  }
  0x7b   :  { %1896 = vmatprep.subr.bf16.mxu1 %v2221_v23  ;;  %1250 = vmatprep.mubr.bf16.mxu1 %v102_v3  ;;  %v2267_v3 = vld [vmem:[#allocation5 + $0x1b8] ss:$12 sps:$4 sm:$0xff]   ;;  %v2291_v23 = vld [vmem:[#allocation5 + $0x2f0] ss:$12 sps:$4 sm:$0xff]  }
  0x7c   :  { %1209 = vmatprep.mubr.bf16.mxu0 %v106_v4  ;;  %v2290_v22 = vld [vmem:[#allocation5 + $0x46c] ss:$12 sps:$4 sm:$0xff]  }
  0x7d   :  { %1180 = vmatpush1.bf16.msra.mxu0 %v2218_v24  ;;  %v2288_v24 = vld [vmem:[#allocation5 + $0x468] ss:$12 sps:$4 sm:$0xff]  }
  0x7e   :  { %1897 = vmatpush3.bf16.msra.mxu1 %v2222_v25  ;;  %1181 = vmatprep.subr.bf16.mxu0 %v2225_v26  ;;  %v2292_v25 = vld [vmem:[#allocation5 + $0x230] ss:$12 sps:$4 sm:$0xff]   ;;  %v2293_v26 = vld [vmem:[#allocation5 + $0x3c8] ss:$12 sps:$4 sm:$0xff]  }
  0x7f   :  { %1898 = vmatprep.subr.bf16.mxu1 %v2226_v27  ;;  %v105_v27 = vpack.c.bf16 %v93_v62, %v93_v62  ;;  %v1887_v62 = vld [vmem:[#allocation7 + $0x88] sm:$0xff]  }
  0x81   :  { %1182 = vmatpush1.bf16.msra.mxu0 %v2223_v28  ;;  %v2294_v28 = vld [vmem:[#allocation5 + $0x308] ss:$12 sps:$4 sm:$0xff]  }
  0x82   :  { %1899 = vmatpush3.bf16.msra.mxu1 %v2227_v29  ;;  %1183 = vmatprep.subr.bf16.mxu0 %v2230_v30  ;;  %v2295_v29 = vld [vmem:[#allocation5 + $0x3e0] ss:$12 sps:$4 sm:$0xff]  }
  0x83   :  { %1900 = vmatprep.subr.bf16.mxu1 %v2231_v31  ;;  %v2296_v30 = vld [vmem:[#allocation5 + $0x320] ss:$12 sps:$4 sm:$0xff]   ;;  %v2297_v31 = vld [vmem:[#allocation5 + $0x3f8] ss:$12 sps:$4 sm:$0xff]  }
  0x85   :  { %1184 = vmatpush1.bf16.msra.mxu0 %v2228_v32  ;;  %v2298_v32 = vld [vmem:[#allocation5 + $0x338] ss:$12 sps:$4 sm:$0xff]  }
  0x86   :  { %1901 = vmatpush3.bf16.msra.mxu1 %v2232_v33  ;;  %1185 = vmatprep.subr.bf16.mxu0 %v2235_v34  ;;  %v2299_v33 = vld [vmem:[#allocation5 + $0x410] ss:$12 sps:$4 sm:$0xff]  }
  0x87   :  { %1902 = vmatprep.subr.bf16.mxu1 %v2236_v35  ;;  %v2300_v34 = vld [vmem:[#allocation5 + $0x350] ss:$12 sps:$4 sm:$0xff]   ;;  %v2301_v35 = vld [vmem:[#allocation5 + $0x428] ss:$12 sps:$4 sm:$0xff]  }
  0x89   :  { %1186 = vmatpush1.bf16.msra.mxu0 %v2233_v36  ;;  %v2302_v36 = vld [vmem:[#allocation5 + $0x368] ss:$12 sps:$4 sm:$0xff]  }
  0x8a   :  { %1903 = vmatpush3.bf16.msra.mxu1 %v2237_v37  ;;  %1187 = vmatprep.subr.bf16.mxu0 %v2240_v38  ;;  %v2303_v37 = vld [vmem:[#allocation5 + $0x440] ss:$12 sps:$4 sm:$0xff]  }
  0x8b   :  { %1904 = vmatprep.subr.bf16.mxu1 %v2241_v39  ;;  %v2304_v38 = vld [vmem:[#allocation5 + $0x380] ss:$12 sps:$4 sm:$0xff]   ;;  %v2306_v39 = vld [vmem:[#allocation5 + $0x398] ss:$12 sps:$4 sm:$0xff]  }
  0x8d   :  { %1188 = vmatpush1.bf16.msra.mxu0 %v2238_v40  ;;  %v2307_v40 = vld [vmem:[#allocation5 + $0x470] ss:$12 sps:$4 sm:$0xff]  }
  0x8e   :  { %1905 = vmatpush3.bf16.msra.mxu1 %v2242_v41  ;;  %1189 = vmatprep.subr.bf16.mxu0 %v2245_v42  ;;  %v1878_v41 = vld [vmem:[#allocation7 + $0x40] sm:$0xff]  }
  0x8f   :  { %1906 = vmatprep.subr.bf16.mxu1 %v2246_v43  ;;  %v1776_v42 = vld [vmem:[#allocation7] sm:$0xff]   ;;  %v1879_v43 = vld [vmem:[#allocation7 + $0x48] sm:$0xff]  }
  0x91   :  { %1190 = vmatpush1.bf16.msra.mxu0 %v2243_v44  ;;  %v2308_v44 = vld [vmem:[#allocation5 + $0x3b0] ss:$12 sps:$4 sm:$0xff]  }
  0x92   :  { %1907 = vmatpush3.bf16.msra.mxu1 %v2247_v45  ;;  %1191 = vmatprep.subr.bf16.mxu0 %v2250_v46  ;;  %v1871_v45 = vld [vmem:[#allocation7 + $0x8] sm:$0xff]   ;;  %v1880_v46 = vld [vmem:[#allocation7 + $0x50] sm:$0xff]  }
  0x93   :  { %1908 = vmatprep.subr.bf16.mxu1 %v2251_v48  ;;  %v1872_v48 = vld [vmem:[#allocation7 + $0x10] sm:$0xff]  }
  0x95   :  { %1192 = vmatpush1.bf16.msra.mxu0 %v2248_v49  ;;  %v1881_v49 = vld [vmem:[#allocation7 + $0x58] sm:$0xff]  }
  0x96   :  { %1909 = vmatpush3.bf16.msra.mxu1 %v2252_v50  ;;  %1193 = vmatprep.subr.bf16.mxu0 %v2255_v51  ;;  %v1873_v50 = vld [vmem:[#allocation7 + $0x18] sm:$0xff]   ;;  %v1882_v51 = vld [vmem:[#allocation7 + $0x60] sm:$0xff]  }
  0x97   :  { %1916 = vmatprep.subr.bf16.mxu1 %v2256_v53  ;;  %v1874_v53 = vld [vmem:[#allocation7 + $0x20] sm:$0xff]  }
  0x99   :  { %1251 = vmatmul.mubr.bf16.vlgmr.msra.gmra.mrb[4].mxu1 %v2497_v19  ;;  %1194 = vmatpush1.bf16.msra.mxu0 %v2253_v54  ;;  %v2283_v19 = vld [vmem:[#allocation5 + $0x450] ss:$12 sps:$4 sm:$0xff]   ;;  %v1883_v54 = vld [vmem:[#allocation7 + $0x68] sm:$0xff]  }
  0x9a   :  { %1917 = vmatpush3.bf16.msra.mxu1 %v2257_v55  ;;  %1195 = vmatprep.subr.bf16.mxu0 %v2260_v56  ;;  %v1875_v55 = vld [vmem:[#allocation7 + $0x28] sm:$0xff]   ;;  %v1884_v56 = vld [vmem:[#allocation7 + $0x70] sm:$0xff]  }
  0x9b   :  { %1918 = vmatprep.subr.bf16.mxu1 %v2261_v58  ;;  %1290 = vmatprep.mubr.bf16.mxu1 %v2494_v7  ;;  %v2276_v7 = vld [vmem:[#allocation5 + $0x2a8] ss:$12 sps:$4 sm:$0xff]   ;;  %v1885_v58 = vld [vmem:[#allocation7 + $0x78] sm:$0xff]  }
  0x9d   :  { %1196 = vmatpush1.bf16.msra.mxu0 %v2258_v60  ;;  %v1886_v60 = vld [vmem:[#allocation7 + $0x80] sm:$0xff]  }
  0x9e   :  { %1919 = vmatpush3.bf16.msra.mxu1 %v2262_v61  ;;  %1197 = vmatprep.subr.bf16.mxu0 %v2265_v63  ;;  %v2412_v61 = vmov 0.0|0.0   ;;  %v1888_v63 = vld [vmem:[#allocation7 + $0x90] sm:$0xff]  }
  0x9f   :  { %1920 = vmatprep.subr.bf16.mxu1 %v2266_v0  ;;  %v1889_v0 = vld [vmem:[#allocation7 + $0x98] sm:$0xff]  }
  0xa1   :  { %1198 = vmatpush1.bf16.msra.mxu0 %v2263_v2  ;;  %v1891_v2 = vld [vmem:[#allocation7 + $0xa8] sm:$0xff]  }
  0xa2   :  { %1921 = vmatpush3.bf16.msra.mxu1 %v2267_v3  ;;  %1199 = vmatprep.subr.bf16.mxu0 %v2270_v5  ;;  %v1892_v3 = vld [vmem:[#allocation7 + $0xb0] sm:$0xff]   ;;  %v2414_v5 = vmov 0.0  }
  0xa3   :  { %1922 = vmatprep.subr.bf16.mxu1 %v2271_v6  ;;  %v311_v6 = vsub.s32 0, %v2487_v47 }
  0xa5   :  { %1200 = vmatpush1.bf16.msra.mxu0 %v2268_v8  ;;  %v299_v8 = vld [vmem:[%s2540_s3] ss:$2 sm:$0x7] }
  0xa6   :  { %1923 = vmatpush3.bf16.msra.mxu1 %v2272_v52  ;;  %1201 = vmatprep.subr.bf16.mxu0 %v2275_v10  ;;  %v315_v52 = vsub.s32 1, %v2487_v47  ;;  %v312_v9 = vrot.slane %v299_v8, %v311_v6 }
  0xa7   :  { %1924 = vmatprep.subr.bf16.mxu1 %v2276_v7 }
  0xa8   :  { %v316_v7 = vrot.slane %v299_v8, %v315_v52 }
  0xa9   :  { %1202 = vmatpush1.bf16.msra.mxu0 %v2273_v11 }
  0xaa   :  { %1925 = vmatpush3.bf16.msra.mxu1 %v2277_v12  ;;  %1203 = vmatprep.subr.bf16.mxu0 %v2280_v13 }
  0xab   :  { %1926 = vmatprep.subr.bf16.mxu1 %v2281_v14 }
  0xad   :  { %1204 = vmatpush1.bf16.msra.mxu0 %v2278_v15 }
  0xae   :  { %1927 = vmatpush3.bf16.msra.mxu1 %v2282_v16  ;;  %1205 = vmatprep.subr.bf16.mxu0 %v2285_v17 }
  0xaf   :  { %1928 = vmatprep.subr.bf16.mxu1 %v2286_v18 }
  0xb1   :  { %1206 = vmatpush1.bf16.msra.mxu0 %v2283_v19 }
  0xb2   :  { %1929 = vmatpush3.bf16.msra.mxu1 %v2287_v21  ;;  %1207 = vmatprep.subr.bf16.mxu0 %v2290_v22 }
  0xb3   :  { %1930 = vmatprep.subr.bf16.mxu1 %v2291_v23 }
  0xb5   :  { %1208 = vmatpush1.bf16.msra.mxu0 %v2288_v24 }
  0xb6   :  { %1931 = vmatpush3.bf16.msra.mxu1 %v2292_v25  ;;  %1938 = vmatprep.subr.bf16.mxu0 %v2293_v26 }
  0xb7   :  { %2048 = vmatprep.subr.bf16.mxu1 %v1878_v41 }
  0xb8   :  { %1210 = vmatmul.mubr.bf16.vlgmr.msra.gmra.mrb[4].mxu0 %v105_v27 }
  0xb9   :  { %1291 = vmatmul.mubr.bf16.vlgmr.msra.gmra.mrb[8].mxu1 %v2499_v20  ;;  %1939 = vmatpush3.bf16.msra.mxu0 %v2294_v28  ;;  %v2305_v20 = vld [vmem:[#allocation5 + $0x458] ss:$12 sps:$4 sm:$0xff]  }
  0xba   :  { %1330 = vmatprep.mubr.bf16.mxu0 %v106_v4  ;;  %1940 = vmatprep.subr.bf16.mxu0 %v2295_v29  ;;  %v1893_v4 = vld [vmem:[#allocation7 + $0xb8] sm:$0xff]  }
  0xbb   :  { %2050 = vmatpush3.bf16.msra.mxu1 %v1776_v42 }
  0xbc   :  { %2052 = vmatprep.subr.bf16.mxu1 %v1879_v43 }
  0xbd   :  { %1941 = vmatpush3.bf16.msra.mxu0 %v2296_v30 }
  0xbe   :  { %1942 = vmatprep.subr.bf16.mxu0 %v2297_v31  ;;  %v319_v31 = vsub.s32 2, %v2487_v47 }
  0xbf   :  { %2054 = vmatpush3.bf16.msra.mxu1 %v1871_v45 }
  0xc0   :  { %2056 = vmatprep.subr.bf16.mxu1 %v1880_v46 }
  0xc1   :  { %1943 = vmatpush3.bf16.msra.mxu0 %v2298_v32  ;;  %v320_v32 = vrot.slane %v299_v8, %v319_v31 }
  0xc2   :  { %1944 = vmatprep.subr.bf16.mxu0 %v2299_v33 }
  0xc3   :  { %2058 = vmatpush3.bf16.msra.mxu1 %v1872_v48 }
  0xc4   :  { %2060 = vmatprep.subr.bf16.mxu1 %v1881_v49 }
  0xc5   :  { %1945 = vmatpush3.bf16.msra.mxu0 %v2300_v34  ;;  %v1628_v34 = vld [vmem:[%s2540_s3 + $0x1] ss:$2 sm:$0x7] }
  0xc6   :  { %1946 = vmatprep.subr.bf16.mxu0 %v2301_v35 }
  0xc7   :  { %2062 = vmatpush3.bf16.msra.mxu1 %v1873_v50 }
  0xc8   :  { %2064 = vmatprep.subr.bf16.mxu1 %v1882_v51 }
  0xc9   :  { %1947 = vmatpush3.bf16.msra.mxu0 %v2302_v36 }
  0xca   :  { %1948 = vmatprep.subr.bf16.mxu0 %v2303_v37 }
  0xcb   :  { %2066 = vmatpush3.bf16.msra.mxu1 %v1874_v53 }
  0xcc   :  { %2068 = vmatprep.subr.bf16.mxu1 %v1883_v54 }
  0xcd   :  { %1949 = vmatpush3.bf16.msra.mxu0 %v2304_v38  ;;  %v1346_v38 = vrot.slane %v1628_v34, %v315_v52 }
  0xce   :  { %1950 = vmatprep.subr.bf16.mxu0 %v2305_v20 }
  0xcf   :  { %2070 = vmatpush3.bf16.msra.mxu1 %v1875_v55  ;;  %v1350_v55 = vrot.slane %v1628_v34, %v319_v31 }
  0xd0   :  { %2072 = vmatprep.subr.bf16.mxu1 %v1884_v56 }
  0xd1   :  { %1951 = vmatpush3.bf16.msra.mxu0 %v2306_v39  ;;  %v1342_v39 = vrot.slane %v1628_v34, %v311_v6 }
  0xd2   :  { %1952 = vmatprep.subr.bf16.mxu0 %v2307_v40 }
  0xd3   :  { %2074 = vmatpush3.bf16.msra.mxu1 %v1876_v57 }
  0xd4   :  { %2076 = vmatprep.subr.bf16.mxu1 %v1885_v58 }
  0xd5   :  { %1953 = vmatpush3.bf16.msra.mxu0 %v2308_v44 }
  0xd6   :  { %2079 = vmatprep.subr.bf16.mxu0 %v2412_v61 }
  0xd7   :  { %2078 = vmatpush3.bf16.msra.mxu1 %v1877_v59 }
  0xd8   :  { %1331 = vmatmul.mubr.bf16.vlgmr.msra.gmra.mrb[8].mxu0 %v105_v27 }
  0xd9   :  { %2081 = vmatpush3.bf16.msra.mxu0 %v1886_v60  ;;  %2044 = vmatprep.mubr.msk.f32.mxu0 %vm2413_vm0, %v2414_v5  ;;  %v1774_v5 = vld [vmem:[%s2542_s5 + $0x1] ss:$0 sm:$0xff] }
  0xda   :  { %2082 = vmatprep.subr.bf16.mxu0 %v2412_v61 }
  0xdd   :  { %2084 = vmatpush3.bf16.msra.mxu0 %v1887_v62 }
  0xde   :  { %2085 = vmatprep.subr.bf16.mxu0 %v2412_v61 }
  0xe1   :  { %2087 = vmatpush3.bf16.msra.mxu0 %v1888_v63  ;;  %v1773_v63 = vld [vmem:[%s2542_s5] ss:$0 sm:$0xff] }
  0xe2   :  { %2088 = vmatprep.subr.bf16.mxu0 %v2412_v61 }
  0xe5   :  { %2090 = vmatpush3.bf16.msra.mxu0 %v1889_v0 }
  0xe6   :  { %2091 = vmatprep.subr.bf16.mxu0 %v2412_v61 }
  0xe9   :  { %2093 = vmatpush3.bf16.msra.mxu0 %v1890_v1 }
  0xea   :  { %2094 = vmatprep.subr.bf16.mxu0 %v2412_v61 }
  0xed   :  { %2096 = vmatpush3.bf16.msra.mxu0 %v1891_v2 }
  0xee   :  { %2097 = vmatprep.subr.bf16.mxu0 %v2412_v61 }
  0xef   :  { %v306_v10 = vpop.permute.xlu0 %305 }
  0xf0   :  { %v324_v11 = vmul.f32 %v312_v9, %v306_v10  ;;  %v325_v12 = vmul.f32 %v316_v7, %v306_v10  ;;  %v326_v33 = vmul.f32 %v320_v32, %v306_v10 }
  0xf1   :  { %2099 = vmatpush3.bf16.msra.mxu0 %v1892_v3 }
  0xf2   :  { %2100 = vmatprep.subr.bf16.mxu0 %v2412_v61 }
  0xf5   :  { %2102 = vmatpush3.bf16.msra.mxu0 %v1893_v4 }
 0x14b   :  { %v1129_v13 = vpop.f32.mrb[0].mxu0 }
 0x14c   :  { %v1170_v14 = vpop.f32.mrb[0].mxu1  ;;  %v1130_v15 = vadd.f32 %v1129_v13, %v324_v11  ;;  %v1131_v16 = vpop.f32.mrb[1].mxu0 }
 0x14d   :  { %v1172_v17 = vpop.f32.mrb[1].mxu1  ;;  %v1132_v18 = vadd.f32 %v1131_v16, %v325_v12  ;;  %v1133_v19 = vpop.f32.mrb[2].mxu0 }
 0x14e   :  { %v1174_v21 = vpop.f32.mrb[2].mxu1  ;;  %v1171_v22 = vadd.f32 %v1170_v14, %v1130_v15  ;;  %v1134_v23 = vpop.f32.mrb[3].mxu0 }
 0x14f   :  { %v1175_v24 = vpop.f32.mrb[3].mxu1  ;;  %v1173_v25 = vadd.f32 %v1172_v17, %v1132_v18 }
 0x16c   :  { %v1910_v26 = vpop.f32.mrb[4].mxu1 }
 0x16d   :  { %v1911_v27 = vpop.f32.mrb[5].mxu1 }
 0x16e   :  { %v1912_v28 = vadd.f32 %v1911_v27, %v1910_v26  ;;  %v1913_v29 = vpop.f32.mrb[6].mxu1 }
 0x16f   :  { %v1914_v30 = vpop.f32.mrb[7].mxu1 }
 0x170   :  { %v1253_v35 = vadd.f32 %v1912_v28, %v326_v33 }
 0x18b   :  { %v1211_v36 = vpop.f32.mrb[4].mxu0 }
 0x18c   :  { %v1932_v37 = vpop.f32.mrb[8].mxu1  ;;  %v1212_v20 = vadd.f32 %v1211_v36, %v1171_v22  ;;  %v1213_v40 = vpop.f32.mrb[5].mxu0 }
 0x18d   :  { %v1933_v41 = vpop.f32.mrb[9].mxu1  ;;  %v1214_v42 = vadd.f32 %v1213_v40, %v1173_v25  ;;  %v1215_v44 = vpop.f32.mrb[6].mxu0 }
 0x18e   :  { %v1934_v43 = vadd.f32 %v1933_v41, %v1932_v37  ;;  %v1935_v45 = vpop.f32.mrb[10].mxu1  ;;  %v1216_v46 = vpop.f32.mrb[7].mxu0  ;;  %v1354_v50 = vadd.f32 %v1342_v39, %v1212_v20 }
 0x18f   :  { %v1936_v47 = vpop.f32.mrb[11].mxu1  ;;  %v1355_v48 = vadd.f32 %v1346_v38, %v1214_v42 }
 0x190   :  { %v1293_v49 = vadd.f32 %v1934_v43, %v1253_v35 }
 0x191   :  { %1523 = vmatprep.mubr.f32.mxu1 %v1355_v48 }
 0x192   :  { %1524 = vmatmul.mubr.f32.vlgmr.msra.gmra.mrb[12].mxu1 %v1354_v50 }
 0x1ab   :  { %v1954_v51 = vpop.f32.mrb[8].mxu0 }
 0x1ac   :  { %v1955_v53 = vpop.f32.mrb[9].mxu0 }
 0x1ad   :  { %v1956_v54 = vadd.f32 %v1955_v53, %v1954_v51  ;;  %v1957_v56 = vpop.f32.mrb[10].mxu0 }
 0x1ae   :  { %v1958_v57 = vpop.f32.mrb[11].mxu0 }
 0x1af   :  { %v1333_v58 = vadd.f32 %v1956_v54, %v1293_v49 }
 0x1b1   :  { %v1356_v59 = vadd.f32 %v1350_v55, %v1333_v58 }
 0x1b3   :  { %2045 = vmatmul.mubr.f32.vlgmr.msra.gmra.mrb[12].mxu0 %v1356_v59 }
 0x265   :  { %v1992_v60 = vpop.f32.mrb[12].mxu1 }
 0x266   :  { %v1993_v61 = vpop.f32.mrb[13].mxu1 }
 0x267   :  { %v1994_v62 = vadd.f32 %v1993_v61, %v1992_v60 }
 0x269   :  { %v1526_v0 = vadd.f32 %v1994_v62, %v1773_v63 }
 0x286   :  { %v1595_v1 = vpop.f32.mrb[12].mxu0 }
 0x287   :  { %v1596_v2 = vadd.f32 %v1595_v1, %v1526_v0  ;;  %v2046_v3 = vpop.f32.mrb[13].mxu0 }
 0x289   :  { %vm1599_vm1 = vcmp.ge.f32.partialorder %v1596_v2, 0.0  ;;  %v1600_v4 = vmul.f32 1e-06, %v1596_v2 }
 0x28b   :  { %v1601_v6 = vsel %vm1599_vm1, %v1596_v2, %v1600_v4 }
 0x28c   :  { %v1606_v8 = vmul.f32 %v1774_v5, %v1601_v6 }
 0x28e   :  { %v1608_v52 = vsel %vm1607_vm2, %v1606_v8, 0.0 }
 0x28f   :  { %1609 = vadd.xlane.f32.xlu0 %v1608_v52 }
 0x31c   :  { %v1610_v9 = vpop.xlane.xlu0 %1609 }
 0x31d   :  { %1611 = vst [vmem:[#allocation8] sm:$0x3] %v1610_v9 }
 0x31e   :  { %2386 = shalt.err (!%p2383_p0)
}
 0x31f   :  { %s2387_s5 = scalar_lea.hbm %s2543_s6, 32 }
 0x320   :  { %p2388_p1 = scmp.ne.s32.totalorder %s2543_s6, %s2387_s5  ;;  %p2391_p2 = scmp.lt.u32.totalorder %s2387_s5, %s2543_s6 }
 0x322   :  { %p2393_p3 = pnand %p2391_p2, %p2388_p1 }
 0x324   :  { %2396 = shalt.err (!%p2393_p3)
}
 0x325   :  { %1621 = dma.vmem_to_hbm [thread:$0]  %s1619_s19, 32, %s2543_s6, [#allocation4]  }
 0x326   :  { %2401 = dma.done.wait [#allocation4], 32  }
 0x327   :  { %2402 = vsyncadd [#allocation4], 4294967264 }
 0x328   :  { %1625 = vsyncpa [#allocation3], 1 }
 0x329   :  { %1626 = vsyncpa [#allocation6], 1 }
 0x32a   :  { %1627 = vsyncpa [#allocation4], 1 }

</bundles_post_ra>
